<compile_context>
chip_gen: v7x
topology: tpu7x:2x2x1
jax: 0.10.0
libtpu: 0.0.40
codegen_flags: <defaults>
</compile_context>

<pallas_src>
import jax
import jax.numpy as jnp
from jax import lax
from jax.experimental import pallas as pl
from jax.experimental.pallas import tpu as pltpu


def _make_mpconv_kernel(H, W, KH, KW, Cin, Cout, pad):
    """Per-batch-element conv kernel body with all shapes baked in statically."""
    L = H * W

    def kernel(col_ref, x_ref, w_ref, o_ref):
        # col_ref: (1, L) int32     column index (i mod W) for every output lane
        # x_ref  : (1, Cin, L+2*pad) flattened input with zero halo on the lane axis
        # w_ref  : (KH*KW, Cout, Cin) per-tap weights (already gain/fan-in scaled)
        # o_ref  : (1, Cout, L)      lane-dense output slab
        x = x_ref[0]                 # (Cin, Lp)  -- single VMEM load, ~3 vregs
        col = col_ref[...]           # (1, L)

        # Column-validity masks for horizontal taps (hoisted out of the tap loop,
        # pre-broadcast so no per-use broadcast_in_dim inside the loop).
        masks = {}
        for dx in range(KW):
            kx = dx - KW // 2
            if kx != 0 and kx not in masks:
                m = ((col + kx) >= 0) & ((col + kx) < W)     # (1, L)
                masks[kx] = jnp.broadcast_to(m, (Cin, L))    # (Cin, L)

        # f32 accumulator: (Cout, L) = (8, 256) -> just 2 vregs.
        acc = jnp.zeros((Cout, L), dtype=jnp.float32)
        for dy in range(KH):
            ky = dy - KH // 2
            for dx in range(KW):
                kx = dx - KW // 2
                # Shifted window: x_padflat[:, pad + i + ky*W + kx] == x[:, h+ky, w+kx]
                # whenever the column is valid; row under/overflow lands in the
                # zero halo, column wrap-around is masked below.
                s = pad + ky * W + kx                         # static lane offset
                xt = x[:, s:s + L]                            # (Cin, L)
                if kx != 0:
                    xt = jnp.where(masks[kx], xt, 0.0)
                wt = w_ref[dy * KW + dx]                      # (Cout, Cin)
                # MXU matmul: lane dim of the result is the 256-long spatial axis.
                acc = acc + jnp.dot(wt, xt, preferred_element_type=jnp.float32)

        o_ref[0] = acc.astype(o_ref.dtype)

    return kernel


def mpconv_forward(x_nchw, weight, gain=1.0):
    """MPConv.forward (eval mode) for 4-D weight (conv2d path), groups=1, stride=1."""
    # TODO(synk): groups > 1 and stride > 1 (supported by the PyTorch module) are not
    # implemented; the instantiated module below uses groups=1, stride=1.
    Cout, Cin, KH, KW = weight.shape
    N, Cx, H, W = x_nchw.shape
    assert Cx == Cin
    # PyTorch conv2d with padding=k//2 changes the spatial size for even kernels;
    # only odd kernels (the 3x3 actually used) are supported here.
    assert KH % 2 == 1 and KW % 2 == 1, "even kernel sizes not supported"

    L = H * W
    pad = (KH // 2) * W + (KW // 2)         # halo so every tap shift stays in-bounds
    Lp = L + 2 * pad

    # --- parameter glue (plain JAX, matches the PyTorch forward exactly) ---
    fan_in = Cin * KH * KW                  # w[0].numel()
    w = weight.astype(jnp.float32) * (gain / fan_in ** 0.5)
    w = w.astype(x_nchw.dtype)
    # (Cout, Cin, KH, KW) -> (KH*KW, Cout, Cin): one (Cout, Cin) matrix per tap.
    w_taps = jnp.transpose(w, (2, 3, 0, 1)).reshape(KH * KW, Cout, Cin)

    # NCHW -> (N, Cin, H*W) is a free reshape (no transpose); then a tiny 1-D halo pad.
    x_flat = x_nchw.reshape(N, Cin, L)
    x_pad = jnp.pad(x_flat, ((0, 0), (0, 0), (pad, pad)))

    # Column index of every flattened output position (used for boundary masking).
    col_ids = (jnp.arange(L, dtype=jnp.int32) % W).reshape(1, L)

    kernel = _make_mpconv_kernel(H, W, KH, KW, Cin, Cout, pad)

    out_flat = pl.pallas_call(
        kernel,
        out_shape=jax.ShapeDtypeStruct((N, Cout, L), x_nchw.dtype),
        grid_spec=pltpu.PrefetchScalarGridSpec(
            num_scalar_prefetch=0,
            grid=(N,),
            in_specs=[
                pl.BlockSpec((1, L), lambda n: (0, 0)),            # col ids (resident)
                pl.BlockSpec((1, Cin, Lp), lambda n: (n, 0, 0)),   # per-batch input slab
                pl.BlockSpec((KH * KW, Cout, Cin), lambda n: (0, 0, 0)),  # weights (resident)
            ],
            out_specs=pl.BlockSpec((1, Cout, L), lambda n: (n, 0, 0)),
        ),
        compiler_params=pltpu.CompilerParams(
            dimension_semantics=("parallel",)),   # shards batch over v7x's 2 TCs
    )(col_ids, x_pad, w_taps)

    # (N, Cout, H*W) -> NCHW is again a free reshape (no transpose needed).
    return out_flat.reshape(N, Cout, H, W)


def _reference_conv(x_nchw, weight, gain=1.0):
    """Pure-JAX reference replicating the PyTorch conv2d path (for verification)."""
    Cout, Cin, KH, KW = weight.shape
    fan_in = Cin * KH * KW
    w = weight.astype(jnp.float32) * (gain / fan_in ** 0.5)
    w = w.astype(x_nchw.dtype)
    return lax.conv_general_dilated(
        x_nchw, w,
        window_strides=(1, 1),
        padding=((KH // 2, KH // 2), (KW // 2, KW // 2)),
        dimension_numbers=("NCHW", "OIHW", "NCHW"),
    )


if __name__ == "__main__":
    # Module config: MPConv(in_channels=4, out_channels=8, kernel=(3, 3))
    in_channels, out_channels, kernel_hw = 4, 8, (3, 3)
    N, H, W = 2, 16, 16

    key = jax.random.PRNGKey(0)
    kx, kw = jax.random.split(key)
    x = jax.random.normal(kx, (N, in_channels, H, W), dtype=jnp.float32)
    weight = jax.random.normal(
        kw, (out_channels, in_channels, *kernel_hw), dtype=jnp.float32)

    y = mpconv_forward(x, weight, gain=1.0)
    y = jax.block_until_ready(y)

    y_ref = _reference_conv(x, weight, gain=1.0)
    assert y.shape == (N, out_channels, H, W)
    assert jnp.allclose(y, y_ref, atol=1e-3, rtol=1e-3), "mismatch vs reference conv"

    print("KERNEL_OK")
</pallas_src>

<mosaic_0001>
module attributes {stable_mosaic.version = 11 : i64} {
  func.func @kernel(%arg0: i32, %arg1: memref<1x256xi32, #tpu.memory_space<vmem>>, %arg2: memref<1x4x290xf32, #tpu.memory_space<vmem>>, %arg3: memref<9x8x4xf32, #tpu.memory_space<vmem>>, %arg4: memref<1x8x256xf32, #tpu.memory_space<vmem>>) attributes {dimension_semantics = [#tpu.dimension_semantics<parallel>], iteration_bounds = array<i64: 2>, scalar_prefetch = 0 : i64, scratch_operands = 0 : i64, tpu.core_type = #tpu.core_type<tc>, window_params = [{pipeline_mode = #tpu.pipeline_mode<synchronous>, transform_indices = @transform_0, window_bounds = array<i64: 1, 256>}, {transform_indices = @transform_1, window_bounds = array<i64: 1, 4, 290>}, {pipeline_mode = #tpu.pipeline_mode<synchronous>, transform_indices = @transform_2, window_bounds = array<i64: 9, 8, 4>}, {transform_indices = @transform_3, window_bounds = array<i64: 1, 8, 256>}]} {
    %c0 = arith.constant 0 : index
    %c0_0 = arith.constant 0 : index
    %c0_1 = arith.constant 0 : index
    %0 = vector.load %arg2[%c0, %c0_0, %c0_1] : memref<1x4x290xf32, #tpu.memory_space<vmem>>, vector<1x4x290xf32>
    %1 = vector.shape_cast %0 : vector<1x4x290xf32> to vector<4x290xf32>
    %c0_2 = arith.constant 0 : index
    %c0_3 = arith.constant 0 : index
    %2 = vector.load %arg1[%c0_2, %c0_3] : memref<1x256xi32, #tpu.memory_space<vmem>>, vector<1x256xi32>
    %c-1_i32 = arith.constant -1 : i32
    %3 = vector.broadcast %c-1_i32 : i32 to vector<1x256xi32>
    %4 = arith.addi %2, %3 : vector<1x256xi32>
    %c0_i32 = arith.constant 0 : i32
    %5 = vector.broadcast %c0_i32 : i32 to vector<1x256xi32>
    %6 = arith.cmpi sge, %4, %5 : vector<1x256xi32>
    %c-1_i32_4 = arith.constant -1 : i32
    %7 = vector.broadcast %c-1_i32_4 : i32 to vector<1x256xi32>
    %8 = arith.addi %2, %7 : vector<1x256xi32>
    %c16_i32 = arith.constant 16 : i32
    %9 = vector.broadcast %c16_i32 : i32 to vector<1x256xi32>
    %10 = arith.cmpi slt, %8, %9 : vector<1x256xi32>
    %11 = arith.andi %6, %10 : vector<1x256xi1>
    %12 = vector.shape_cast %11 : vector<1x256xi1> to vector<1x256xi1>
    %13 = vector.broadcast %12 : vector<1x256xi1> to vector<4x256xi1>
    %c1_i32 = arith.constant 1 : i32
    %14 = vector.broadcast %c1_i32 : i32 to vector<1x256xi32>
    %15 = arith.addi %2, %14 : vector<1x256xi32>
    %c0_i32_5 = arith.constant 0 : i32
    %16 = vector.broadcast %c0_i32_5 : i32 to vector<1x256xi32>
    %17 = arith.cmpi sge, %15, %16 : vector<1x256xi32>
    %c1_i32_6 = arith.constant 1 : i32
    %18 = vector.broadcast %c1_i32_6 : i32 to vector<1x256xi32>
    %19 = arith.addi %2, %18 : vector<1x256xi32>
    %c16_i32_7 = arith.constant 16 : i32
    %20 = vector.broadcast %c16_i32_7 : i32 to vector<1x256xi32>
    %21 = arith.cmpi slt, %19, %20 : vector<1x256xi32>
    %22 = arith.andi %17, %21 : vector<1x256xi1>
    %23 = vector.shape_cast %22 : vector<1x256xi1> to vector<1x256xi1>
    %24 = vector.broadcast %23 : vector<1x256xi1> to vector<4x256xi1>
    %cst = arith.constant 0.000000e+00 : f32
    %25 = vector.broadcast %cst : f32 to vector<8x256xf32>
    %26 = vector.extract_strided_slice %1 {offsets = [0, 0], sizes = [4, 256], strides = [1, 1]} : vector<4x290xf32> to vector<4x256xf32>
    %cst_8 = arith.constant 0.000000e+00 : f32
    %27 = vector.broadcast %cst_8 : f32 to vector<4x256xf32>
    %28 = arith.select %13, %26, %27 : vector<4x256xi1>, vector<4x256xf32>
    %c0_9 = arith.constant 0 : index
    %c0_10 = arith.constant 0 : index
    %c0_11 = arith.constant 0 : index
    %29 = vector.load %arg3[%c0_9, %c0_10, %c0_11] : memref<9x8x4xf32, #tpu.memory_space<vmem>>, vector<1x8x4xf32>
    %30 = vector.shape_cast %29 : vector<1x8x4xf32> to vector<8x4xf32>
    %cst_12 = arith.constant dense<0.000000e+00> : vector<8x256xf32>
    %31 = tpu.matmul %30, %28, %cst_12 {dimension_numbers = #tpu.dot_dimension_numbers<[1], [0], [0], [1], [0, 0, 1, 1], [], []>} : vector<8x4xf32>, vector<4x256xf32>, vector<8x256xf32> -> vector<8x256xf32>
    %32 = arith.addf %25, %31 : vector<8x256xf32>
    %33 = vector.extract_strided_slice %1 {offsets = [0, 1], sizes = [4, 256], strides = [1, 1]} : vector<4x290xf32> to vector<4x256xf32>
    %c1 = arith.constant 1 : index
    %c0_13 = arith.constant 0 : index
    %c0_14 = arith.constant 0 : index
    %34 = vector.load %arg3[%c1, %c0_13, %c0_14] : memref<9x8x4xf32, #tpu.memory_space<vmem>>, vector<1x8x4xf32>
    %35 = vector.shape_cast %34 : vector<1x8x4xf32> to vector<8x4xf32>
    %cst_15 = arith.constant dense<0.000000e+00> : vector<8x256xf32>
    %36 = tpu.matmul %35, %33, %cst_15 {dimension_numbers = #tpu.dot_dimension_numbers<[1], [0], [0], [1], [0, 0, 1, 1], [], []>} : vector<8x4xf32>, vector<4x256xf32>, vector<8x256xf32> -> vector<8x256xf32>
    %37 = arith.addf %32, %36 : vector<8x256xf32>
    %38 = vector.extract_strided_slice %1 {offsets = [0, 2], sizes = [4, 256], strides = [1, 1]} : vector<4x290xf32> to vector<4x256xf32>
    %cst_16 = arith.constant 0.000000e+00 : f32
    %39 = vector.broadcast %cst_16 : f32 to vector<4x256xf32>
    %40 = arith.select %24, %38, %39 : vector<4x256xi1>, vector<4x256xf32>
    %c2 = arith.constant 2 : index
    %c0_17 = arith.constant 0 : index
    %c0_18 = arith.constant 0 : index
    %41 = vector.load %arg3[%c2, %c0_17, %c0_18] : memref<9x8x4xf32, #tpu.memory_space<vmem>>, vector<1x8x4xf32>
    %42 = vector.shape_cast %41 : vector<1x8x4xf32> to vector<8x4xf32>
    %cst_19 = arith.constant dense<0.000000e+00> : vector<8x256xf32>
    %43 = tpu.matmul %42, %40, %cst_19 {dimension_numbers = #tpu.dot_dimension_numbers<[1], [0], [0], [1], [0, 0, 1, 1], [], []>} : vector<8x4xf32>, vector<4x256xf32>, vector<8x256xf32> -> vector<8x256xf32>
    %44 = arith.addf %37, %43 : vector<8x256xf32>
    %45 = vector.extract_strided_slice %1 {offsets = [0, 16], sizes = [4, 256], strides = [1, 1]} : vector<4x290xf32> to vector<4x256xf32>
    %cst_20 = arith.constant 0.000000e+00 : f32
    %46 = vector.broadcast %cst_20 : f32 to vector<4x256xf32>
    %47 = arith.select %13, %45, %46 : vector<4x256xi1>, vector<4x256xf32>
    %c3 = arith.constant 3 : index
    %c0_21 = arith.constant 0 : index
    %c0_22 = arith.constant 0 : index
    %48 = vector.load %arg3[%c3, %c0_21, %c0_22] : memref<9x8x4xf32, #tpu.memory_space<vmem>>, vector<1x8x4xf32>
    %49 = vector.shape_cast %48 : vector<1x8x4xf32> to vector<8x4xf32>
    %cst_23 = arith.constant dense<0.000000e+00> : vector<8x256xf32>
    %50 = tpu.matmul %49, %47, %cst_23 {dimension_numbers = #tpu.dot_dimension_numbers<[1], [0], [0], [1], [0, 0, 1, 1], [], []>} : vector<8x4xf32>, vector<4x256xf32>, vector<8x256xf32> -> vector<8x256xf32>
    %51 = arith.addf %44, %50 : vector<8x256xf32>
    %52 = vector.extract_strided_slice %1 {offsets = [0, 17], sizes = [4, 256], strides = [1, 1]} : vector<4x290xf32> to vector<4x256xf32>
    %c4 = arith.constant 4 : index
    %c0_24 = arith.constant 0 : index
    %c0_25 = arith.constant 0 : index
    %53 = vector.load %arg3[%c4, %c0_24, %c0_25] : memref<9x8x4xf32, #tpu.memory_space<vmem>>, vector<1x8x4xf32>
    %54 = vector.shape_cast %53 : vector<1x8x4xf32> to vector<8x4xf32>
    %cst_26 = arith.constant dense<0.000000e+00> : vector<8x256xf32>
    %55 = tpu.matmul %54, %52, %cst_26 {dimension_numbers = #tpu.dot_dimension_numbers<[1], [0], [0], [1], [0, 0, 1, 1], [], []>} : vector<8x4xf32>, vector<4x256xf32>, vector<8x256xf32> -> vector<8x256xf32>
    %56 = arith.addf %51, %55 : vector<8x256xf32>
    %57 = vector.extract_strided_slice %1 {offsets = [0, 18], sizes = [4, 256], strides = [1, 1]} : vector<4x290xf32> to vector<4x256xf32>
    %cst_27 = arith.constant 0.000000e+00 : f32
    %58 = vector.broadcast %cst_27 : f32 to vector<4x256xf32>
    %59 = arith.select %24, %57, %58 : vector<4x256xi1>, vector<4x256xf32>
    %c5 = arith.constant 5 : index
    %c0_28 = arith.constant 0 : index
    %c0_29 = arith.constant 0 : index
    %60 = vector.load %arg3[%c5, %c0_28, %c0_29] : memref<9x8x4xf32, #tpu.memory_space<vmem>>, vector<1x8x4xf32>
    %61 = vector.shape_cast %60 : vector<1x8x4xf32> to vector<8x4xf32>
    %cst_30 = arith.constant dense<0.000000e+00> : vector<8x256xf32>
    %62 = tpu.matmul %61, %59, %cst_30 {dimension_numbers = #tpu.dot_dimension_numbers<[1], [0], [0], [1], [0, 0, 1, 1], [], []>} : vector<8x4xf32>, vector<4x256xf32>, vector<8x256xf32> -> vector<8x256xf32>
    %63 = arith.addf %56, %62 : vector<8x256xf32>
    %64 = vector.extract_strided_slice %1 {offsets = [0, 32], sizes = [4, 256], strides = [1, 1]} : vector<4x290xf32> to vector<4x256xf32>
    %cst_31 = arith.constant 0.000000e+00 : f32
    %65 = vector.broadcast %cst_31 : f32 to vector<4x256xf32>
    %66 = arith.select %13, %64, %65 : vector<4x256xi1>, vector<4x256xf32>
    %c6 = arith.constant 6 : index
    %c0_32 = arith.constant 0 : index
    %c0_33 = arith.constant 0 : index
    %67 = vector.load %arg3[%c6, %c0_32, %c0_33] : memref<9x8x4xf32, #tpu.memory_space<vmem>>, vector<1x8x4xf32>
    %68 = vector.shape_cast %67 : vector<1x8x4xf32> to vector<8x4xf32>
    %cst_34 = arith.constant dense<0.000000e+00> : vector<8x256xf32>
    %69 = tpu.matmul %68, %66, %cst_34 {dimension_numbers = #tpu.dot_dimension_numbers<[1], [0], [0], [1], [0, 0, 1, 1], [], []>} : vector<8x4xf32>, vector<4x256xf32>, vector<8x256xf32> -> vector<8x256xf32>
    %70 = arith.addf %63, %69 : vector<8x256xf32>
    %71 = vector.extract_strided_slice %1 {offsets = [0, 33], sizes = [4, 256], strides = [1, 1]} : vector<4x290xf32> to vector<4x256xf32>
    %c7 = arith.constant 7 : index
    %c0_35 = arith.constant 0 : index
    %c0_36 = arith.constant 0 : index
    %72 = vector.load %arg3[%c7, %c0_35, %c0_36] : memref<9x8x4xf32, #tpu.memory_space<vmem>>, vector<1x8x4xf32>
    %73 = vector.shape_cast %72 : vector<1x8x4xf32> to vector<8x4xf32>
    %cst_37 = arith.constant dense<0.000000e+00> : vector<8x256xf32>
    %74 = tpu.matmul %73, %71, %cst_37 {dimension_numbers = #tpu.dot_dimension_numbers<[1], [0], [0], [1], [0, 0, 1, 1], [], []>} : vector<8x4xf32>, vector<4x256xf32>, vector<8x256xf32> -> vector<8x256xf32>
    %75 = arith.addf %70, %74 : vector<8x256xf32>
    %76 = vector.extract_strided_slice %1 {offsets = [0, 34], sizes = [4, 256], strides = [1, 1]} : vector<4x290xf32> to vector<4x256xf32>
    %cst_38 = arith.constant 0.000000e+00 : f32
    %77 = vector.broadcast %cst_38 : f32 to vector<4x256xf32>
    %78 = arith.select %24, %76, %77 : vector<4x256xi1>, vector<4x256xf32>
    %c8 = arith.constant 8 : index
    %c0_39 = arith.constant 0 : index
    %c0_40 = arith.constant 0 : index
    %79 = vector.load %arg3[%c8, %c0_39, %c0_40] : memref<9x8x4xf32, #tpu.memory_space<vmem>>, vector<1x8x4xf32>
    %80 = vector.shape_cast %79 : vector<1x8x4xf32> to vector<8x4xf32>
    %cst_41 = arith.constant dense<0.000000e+00> : vector<8x256xf32>
    %81 = tpu.matmul %80, %78, %cst_41 {dimension_numbers = #tpu.dot_dimension_numbers<[1], [0], [0], [1], [0, 0, 1, 1], [], []>} : vector<8x4xf32>, vector<4x256xf32>, vector<8x256xf32> -> vector<8x256xf32>
    %82 = arith.addf %75, %81 : vector<8x256xf32>
    %c0_42 = arith.constant 0 : index
    %c0_43 = arith.constant 0 : index
    %c0_44 = arith.constant 0 : index
    %83 = vector.load %arg4[%c0_42, %c0_43, %c0_44] : memref<1x8x256xf32, #tpu.memory_space<vmem>>, vector<1x8x256xf32>
    %84 = vector.shape_cast %83 : vector<1x8x256xf32> to vector<8x256xf32>
    %85 = vector.shape_cast %82 : vector<8x256xf32> to vector<1x8x256xf32>
    tpu.vector_store %arg4[%c0_42, %c0_43, %c0_44], %85 {strides = array<i32>} : memref<1x8x256xf32, #tpu.memory_space<vmem>>, vector<1x8x256xf32>,
    return
  }
  func.func @transform_0(%arg0: i32) -> (i32, i32) {
    %c0_i32 = arith.constant 0 : i32
    %c0_i32_0 = arith.constant 0 : i32
    %c0_i32_1 = arith.constant 0 : i32
    return %c0_i32, %c0_i32_0 : i32, i32
  }
  func.func @transform_1(%arg0: i32) -> (i32, i32, i32) {
    %c0_i32 = arith.constant 0 : i32
    %c0_i32_0 = arith.constant 0 : i32
    %c0_i32_1 = arith.constant 0 : i32
    return %arg0, %c0_i32, %c0_i32_0 : i32, i32, i32
  }
  func.func @transform_2(%arg0: i32) -> (i32, i32, i32) {
    %c0_i32 = arith.constant 0 : i32
    %c0_i32_0 = arith.constant 0 : i32
    %c0_i32_1 = arith.constant 0 : i32
    %c0_i32_2 = arith.constant 0 : i32
    return %c0_i32, %c0_i32_0, %c0_i32_1 : i32, i32, i32
  }
  func.func @transform_3(%arg0: i32) -> (i32, i32, i32) {
    %c0_i32 = arith.constant 0 : i32
    %c0_i32_0 = arith.constant 0 : i32
    %c0_i32_1 = arith.constant 0 : i32
    return %arg0, %c0_i32, %c0_i32_0 : i32, i32, i32
  }
}

</mosaic_0001>

<bundles_post_ra>
// kernel: tpu_custom_call.1
= control target key start
LH: loop header
LB: loop body
LE: loop exit
PB: predicated region body
PF: predicated region fallthrough
CT: control target
= control target key end

     0   :  { %8 = vsyncpa [#allocation3], 0  ;;  %s1564_s0 = inlined_call_operand.vmem [shape: s32[1,256], index: 0, kind: input, shape index: {}]   ;;  %s1565_s1 = inlined_call_operand.vmem [shape: f32[2,4,290], index: 1, kind: input, shape index: {}]   ;;  %s1566_s2 = inlined_call_operand.vmem [shape: f32[9,8,4], index: 2, kind: input, shape index: {}]   ;;  %s1567_s3 = inlined_call_operand.hbm [shape: f32[2,8,256], index: 3, kind: output, shape index: {}]  }
   0x1   :  { %10 = vsyncpa [#allocation3 + $0x1], 0  ;;  %s1332_s12 = smov 0   ;;  %s1334_s13 = smov 0  }
   0x2   :  { %s1336_s14 = smov 0   ;;  %s1338_s15 = smov 0  }
   0x3 LB: > { %s1353_s16 = sadd.s32 4294967295, %s1299_s15   ;;  %s1123_s17 = sadd.s32 4294967294, %s1299_s15   ;;  %s1299_s15 = sphi %s1338_s15, %s1573_s15   ;;  %s1295_s14 = sphi %s1336_s14, %s1572_s14   ;;  %s1291_s13 = sphi %s1334_s13, %s1571_s13   ;;  %s1287_s12 = sphi %s1332_s12, %s1570_s12  }
   0x4   : > { %s1357_s18 = sadd.s32 1, %s1299_s15   ;;  %s91_s19 = sadd.s32 1, %s1295_s14 }
   0x5   : > { %s88_s20 = ssub.s32 %s1299_s15, %s1357_s18  ;;  %p101_p0 = scmp.ne.s32.totalorder %s1295_s14, %s1291_s13 }
   0x6   : > { %p89_p1 = scmp.eq.s32.totalorder %s88_s20, 0  ;;  %p102_p2 = scmp.eq.s32.totalorder %s1353_s16, 1 }
   0x7   : > { %p107_p3 = scmp.ne.s32.totalorder %s1291_s13, %s1287_s12  ;;  %p108_p4 = scmp.eq.s32.totalorder %s1123_s17, 1 }
   0x8   : > { %s1368_s21 = scalar_select %p89_p1, %s1295_s14, %s91_s19  }
   0x9   : > { %p1370_p5 = por %p102_p2, %p101_p0  ;;  %p1374_p6 = por %p108_p4, %p107_p3 }
   0xa   : > { %p1126_p7 = scmp.ge.s32.totalorder %s1299_s15, 1  ;;  %p140_p8 = scmp.lt.s32.totalorder %s1299_s15, 3 }
   0xc   : > { %p141_p9 = pnand %p1126_p7, %p140_p8 }
   0xd   : > { %p164_p10 = scmp.lt.s32.totalorder (!%p141_p9), %s1353_s16, 1  ;;  %s1301_s29 = smov (!%p141_p9), 111   ;;  %v1302_v3 = vmov (!%p141_p9), 0.0   ;;  %v171_v4 = vld [vmem:[%s1564_s0] sm:$0x3] (!%p141_p9)  ;;  %v177_v6 = vlaneseq (!%p141_p9)  ;;  %v1310_v12 = vmov (!%p141_p9), 0  }
   0xe   : > { %144 = sbr.rel (%p141_p9) target bundleno = 418 (0x1a2), region = 32  ;;  %656 = vmatprep.mubr.f32.mxu0 (!%p141_p9), %v1302_v3  ;;  %293 = vmatprep.mubr.f32.mxu1 (!%p141_p9), %v1302_v3  ;;  %s1303_s30 = smov (!%p141_p9), 110   ;;  %v187_v5 = vadd.s32 (!%p141_p9), 1, %v171_v4  ;;  %v172_v8 = vadd.s32 (!%p141_p9), 4294967295, %v171_v4  ;;  %vm671_vm5 = vcmask (!%p141_p9), 900096   ;;  %vm582_vm7 = vcmask (!%p141_p9), 908288  }
   0xf   : > { %s1304_s4 = smov (!%p141_p9), 127   ;;  %s1305_s5 = smov (!%p141_p9), 96   ;;  %v178_v7 = vshrl.u32 (!%p141_p9), %v177_v6, 7  ;;  %vm224_vm8 = vcmask (!%p141_p9), 1043456   ;;  %vm220_vm10 = vcmask (!%p141_p9), 31744   ;;  %v1144_v25 = vld [vmem:[%s1566_s2 + $0x20] sm:$0xff] (!%p141_p9) }
  0x10   : > { %s1306_s6 = smov (!%p141_p9), 126   ;;  %s1307_s7 = smov (!%p141_p9), 95   ;;  %vm188_vm0 = vcmp.ge.s32.totalorder (!%p141_p9), %v187_v5, 0  ;;  %vm189_vm1 = vcmp.lt.s32.totalorder (!%p141_p9), %v187_v5, 16  ;;  %vm173_vm3 = vcmp.ge.s32.totalorder (!%p141_p9), %v172_v8, 0  ;;  %vm174_vm4 = vcmp.lt.s32.totalorder (!%p141_p9), %v172_v8, 16 }
  0x11   : > { %s1308_s8 = smov (!%p141_p9), 112   ;;  %s1309_s9 = smov (!%p141_p9), 94   ;;  %vm190_vm2 = vmand (!%p141_p9), %vm188_vm0, %vm189_vm1  ;;  %v183_v11 = vsub.s32 (!%p141_p9), 1, %v178_v7  ;;  %v179_v14 = vsub.s32 (!%p141_p9), 0, %v178_v7  ;;  %vm217_vm11 = vcmask (!%p141_p9), 1039360   ;;  %v1129_v36 = vld [vmem:[%s1566_s2 + $0x8] sm:$0xff] (!%p141_p9) }
  0x12   : > { %v191_v13 = vsel (!%p141_p9), %vm190_vm2, 1, %v1310_v12  ;;  %vm175_vm6 = vmand (!%p141_p9), %vm173_vm3, %vm174_vm4  ;;  %v1148_v39 = vld [vmem:[%s1566_s2 + $0x28] sm:$0xff] (!%p141_p9)  ;;  %vm768_vm15 = vcmask (!%p141_p9), 785408   ;;  %vm386_vm0 = vcmask (!%p141_p9), 1031168   ;;  %v207_v49 = vld [vmem:[%s1566_s2] sm:$0xff] (!%p141_p9)  ;;  %vm867_vm1 = vcmask (!%p141_p9), 777216  }
  0x13   : > { %v1412_v16 = vrot.slane (!%p141_p9), %v191_v13, %v183_v11  ;;  %v1414_v18 = vrot.slane (!%p141_p9), %v191_v13, %v179_v14  ;;  %v176_v22 = vsel (!%p141_p9), %vm175_vm6, 1, %v1310_v12  ;;  %v1152_v51 = vld [vmem:[%s1566_s2 + $0x30] sm:$0xff] (!%p141_p9)  ;;  %v1156_v62 = vld [vmem:[%s1566_s2 + $0x38] sm:$0xff] (!%p141_p9)  ;;  %vm483_vm2 = vcmask (!%p141_p9), 916480   ;;  %v1160_v12 = vld [vmem:[%s1566_s2 + $0x40] sm:$0xff] (!%p141_p9)  ;;  %s161_s17 = sand.u32 (!%p141_p9), 1, %s1291_s13  }
  0x14   : > { %v1426_v27 = vrot.slane (!%p141_p9), %v176_v22, %v183_v11  ;;  %v1430_v30 = vrot.slane (!%p141_p9), %v176_v22, %v179_v14  ;;  %v1136_v59 = vld [vmem:[%s1566_s2 + $0x10] sm:$0xff] (!%p141_p9)  ;;  %vm956_vm3 = vcmask (!%p141_p9), 769024   ;;  %v1140_v11 = vld [vmem:[%s1566_s2 + $0x18] sm:$0xff] (!%p141_p9)  ;;  %s1127_s19 = sshll.u32 (!%p141_p9), %s161_s17, 4  ;;  %s1169_s20 = sshll.u32 (!%p141_p9), %s1353_s16, 8 }
  0x15   : > { %s165_s24 = scalar_select %p164_p10, %s1353_s16, 1  ;;  %vm201_vm9 = vcmp.eq.s32.totalorder %v1412_v16, 1  ;;  %vm200_vm12 = vcmp.eq.s32.totalorder %v1414_v18, 1 }
  0x16   : > { %vm186_vm13 = vcmp.eq.s32.totalorder %v1426_v27, 1  ;;  %vm185_vm14 = vcmp.eq.s32.totalorder %v1430_v30, 1  ;;  %s1050_s16 = scalar_lea.sflag [#allocation3], %s161_s17 }
  0x17   : > { %s1186_s25 = smul.u32 12, %s165_s24  ;;  %s163_s24 = scalar_lea.vmem [#allocation2], %s1127_s19 }
  0x19   : > { %s168_s28 = scalar_lea.vmem %s1565_s1, %s1186_s25  ;;  %s1064_s25 = sshll.u32 %s163_s24, 4  ;;  %s1524_s25 = int_to_ptr.vmem [resolvable:$true] %s1064_s25 }
  0x1a   : > { %v170_v0 = vld [vmem:[%s168_s28 + $0x8] sm:$0xf]  ;;  %v1385_v1 = vld [vmem:[%s168_s28] sm:$0xff]  ;;  %s1522_s28 = scalar_lea.hbm %s1567_s3, %s1169_s20 }
  0x1b   : > { %580 = vrot.lane.b32.xlu0 %v170_v0, %s1301_s29  ;;  %576 = vrot.lane.b32.xlu1 %v1385_v1, %s1301_s29  ;;  %v1390_v2 = vcombine.high %v1385_v1, %v1385_v1  ;;  %v205_v40 = vsel %vm185_vm14, %v1385_v1, 0.0 }
  0x1d   : > { %v206_v37 = vsel %vm186_vm13, %v1390_v2, 0.0 }
  0x1f   : > { %669 = vrot.lane.b32.xlu0 %v170_v0, %s1303_s30  ;;  %667 = vrot.lane.b32.xlu1 %v1390_v2, %s1303_s30 }
  0x23   : > { %213 = vrot.lane.b32.xlu1 %v1390_v2, %s1304_s4  ;;  %578 = vrot.lane.b32.xlu0 %v1390_v2, %s1301_s29  ;;  %s1237_s29 = scalar_lea.vmem %s1524_s25, 256 }
  0x24   : > { %p1238_p11 = scmp.ne.s32.totalorder %s1524_s25, %s1237_s29 }
  0x26   : > { %p1239_p12 = pnand %p1238_p11, %p1370_p5 }
  0x27   : > { %665 = vrot.lane.b32.xlu1 %v1385_v1, %s1303_s30  ;;  %215 = vrot.lane.b32.xlu0 %v170_v0, %s1304_s4  ;;  %s1311_s30 = smov [#allocation2]  }
  0x28   : > { %p1240_p13 = pneg %p1239_p12 }
  0x2b   : > { %764 = vrot.lane.b32.xlu1 %v1390_v2, %s1305_s5  ;;  %211 = vrot.lane.b32.xlu0 %v1385_v1, %s1304_s4  ;;  %s1241_s4 = sshll.u32 %s1311_s30, 4  ;;  %s1242_s4 = int_to_ptr.vmem [resolvable:$false] %s1241_s4 }
  0x2c   : > { %p1244_p0 = scmp.lt.s32.totalorder %s1524_s25, %s1242_s4 }
  0x2f   : > { %762 = vrot.lane.b32.xlu1 %v1385_v1, %s1305_s5  ;;  %766 = vrot.lane.b32.xlu0 %v170_v0, %s1305_s5  ;;  %s1243_s5 = scalar_lea.vmem %s1242_s4, 512 }
  0x30   : > { %p1245_p1 = scmp.lt.s32.totalorder %s1243_s5, %s1237_s29 }
  0x32   : > { %p1246_p2 = por %p1245_p1, %p1244_p0 }
  0x33   : > { %384 = vrot.lane.b32.xlu1 %v170_v0, %s1306_s6  ;;  %382 = vrot.lane.b32.xlu0 %v1390_v2, %s1306_s6 }
  0x34   : > { %p1247_p3 = pnand %p1246_p2, %p1240_p13 }
  0x37   : > { %863 = vrot.lane.b32.xlu1 %v1390_v2, %s1307_s7  ;;  %380 = vrot.lane.b32.xlu0 %v1385_v1, %s1306_s6 }
  0x3b   : > { %861 = vrot.lane.b32.xlu1 %v1385_v1, %s1307_s7  ;;  %865 = vrot.lane.b32.xlu0 %v170_v0, %s1307_s7 }
  0x3f   : > { %481 = vrot.lane.b32.xlu1 %v170_v0, %s1308_s8  ;;  %479 = vrot.lane.b32.xlu0 %v1390_v2, %s1308_s8 }
  0x43   : > { %954 = vrot.lane.b32.xlu1 %v170_v0, %s1309_s9  ;;  %952 = vrot.lane.b32.xlu0 %v1390_v2, %s1309_s9 }
  0x47   : > { %950 = vrot.lane.b32.xlu1 %v1385_v1, %s1309_s9  ;;  %477 = vrot.lane.b32.xlu0 %v1385_v1, %s1308_s8 }
  0x8d   : > { %v581_v9 = vpop.permute.xlu0 %580  ;;  %v577_v10 = vpop.permute.xlu1 %576 }
  0x91   : > { %v670_v15 = vpop.permute.xlu0 %669  ;;  %v668_v17 = vpop.permute.xlu1 %667 }
  0x92   : > { %v673_v19 = vsel %vm671_vm5, %v668_v17, %v670_v15 }
  0x93   : > { %v677_v26 = vsel %vm201_vm9, %v673_v19, 0.0 }
  0x95   : > { %v214_v20 = vpop.permute.xlu1 %213  ;;  %v579_v21 = vpop.permute.xlu0 %578 }
  0x96   : > { %v584_v23 = vsel %vm582_vm7, %v579_v21, %v581_v9  ;;  %v583_v24 = vsel %vm582_vm7, %v577_v10, %v579_v21 }
  0x97   : > { %1145 = vmatprep.subr.msk.mxu0 %vm224_vm8, %v584_v23 }
  0x98   : > { %1146 = vmatpush1.msk.msra.mxu0 %vm224_vm8, %v583_v24 }
  0x99   : > { %v666_v28 = vpop.permute.xlu1 %665  ;;  %1149 = vmatprep.subr.msk.mxu0 %vm224_vm8, %v677_v26  ;;  %v216_v29 = vpop.permute.xlu0 %215  ;;  %1147 = vmatmul.mubr.msk.f32.vlgmr.msra.gmra.mrb[0].mxu0 %vm220_vm10, %v1144_v25 }
  0x9a   : > { %v672_v31 = vsel %vm671_vm5, %v666_v28, %v668_v17  ;;  %v219_v32 = vsel %vm217_vm11, %v214_v20, %v216_v29  ;;  %753 = vmatprep.mubr.f32.mxu0 %v1302_v3 }
  0x9b   : > { %v676_v33 = vsel %vm200_vm12, %v672_v31, 0.0  ;;  %1130 = vmatprep.subr.msk.mxu1 %vm224_vm8, %v219_v32 }
  0x9c   : > { %1150 = vmatpush1.msk.msra.mxu0 %vm224_vm8, %v676_v33 }
  0x9d   : > { %v765_v34 = vpop.permute.xlu1 %764  ;;  %v212_v35 = vpop.permute.xlu0 %211 }
  0x9e   : > { %v218_v38 = vsel %vm217_vm11, %v212_v35, %v214_v20 }
  0x9f   : > { %1131 = vmatpush1.msk.msra.mxu1 %vm224_vm8, %v218_v38 }
  0xa0   : > { %1132 = vmatmul.mubr.msk.f32.vlgmr.msra.gmra.mrb[0].mxu1 %vm220_vm10, %v1129_v36  ;;  %1133 = vmatprep.subr.msk.mxu1 %vm224_vm8, %v206_v37 }
  0xa1   : > { %v763_v41 = vpop.permute.xlu1 %762  ;;  %v767_v42 = vpop.permute.xlu0 %766  ;;  %1151 = vmatmul.mubr.msk.f32.vlgmr.msra.gmra.mrb[0].mxu0 %vm220_vm10, %v1148_v39  ;;  %1134 = vmatpush1.msk.msra.mxu1 %vm224_vm8, %v205_v40 }
  0xa2   : > { %v769_v43 = vsel %vm768_vm15, %v763_v41, %v765_v34  ;;  %v770_v44 = vsel %vm768_vm15, %v765_v34, %v767_v42  ;;  %373 = vmatprep.mubr.f32.mxu1 %v1302_v3  ;;  %850 = vmatprep.mubr.f32.mxu0 %v1302_v3 }
  0xa3   : > { %v773_v45 = vsel %vm185_vm14, %v769_v43, 0.0  ;;  %v774_v46 = vsel %vm186_vm13, %v770_v44, 0.0 }
  0xa4   : > { %1153 = vmatprep.subr.msk.mxu0 %vm224_vm8, %v774_v46 }
  0xa5   : > { %v385_v47 = vpop.permute.xlu1 %384  ;;  %1154 = vmatpush1.msk.msra.mxu0 %vm224_vm8, %v773_v45  ;;  %v383_v48 = vpop.permute.xlu0 %382 }
  0xa6   : > { %v388_v50 = vsel %vm386_vm0, %v383_v48, %v385_v47 }
  0xa7   : > { %v392_v52 = vsel %vm201_vm9, %v388_v50, 0.0 }
  0xa8   : > { %1137 = vmatprep.subr.msk.mxu1 %vm224_vm8, %v392_v52  ;;  %1135 = vmatmul.mubr.msk.f32.vlgmr.msra.gmra.mrb[0].mxu1 %vm220_vm10, %v207_v49 }
  0xa9   : > { %v864_v53 = vpop.permute.xlu1 %863  ;;  %v381_v54 = vpop.permute.xlu0 %380  ;;  %1155 = vmatmul.mubr.msk.f32.vlgmr.msra.gmra.mrb[0].mxu0 %vm220_vm10, %v1152_v51  ;;  %468 = vmatprep.mubr.f32.mxu1 %v1302_v3 }
  0xaa   : > { %v387_v55 = vsel %vm386_vm0, %v381_v54, %v383_v48  ;;  %941 = vmatprep.mubr.f32.mxu0 %v1302_v3 }
  0xab   : > { %v391_v56 = vsel %vm200_vm12, %v387_v55, 0.0 }
  0xac   : > { %1138 = vmatpush1.msk.msra.mxu1 %vm224_vm8, %v391_v56 }
  0xad   : > { %v862_v57 = vpop.permute.xlu1 %861  ;;  %v866_v58 = vpop.permute.xlu0 %865 }
  0xae   : > { %v868_v60 = vsel %vm867_vm1, %v862_v57, %v864_v53  ;;  %v869_v61 = vsel %vm867_vm1, %v864_v53, %v866_v58 }
  0xaf   : > { %1157 = vmatprep.subr.msk.mxu0 %vm224_vm8, %v869_v61 }
  0xb0   : > { %1158 = vmatpush1.msk.msra.mxu0 %vm224_vm8, %v868_v60  ;;  %1139 = vmatmul.mubr.msk.f32.vlgmr.msra.gmra.mrb[0].mxu1 %vm220_vm10, %v1136_v59 }
  0xb1   : > { %v482_v63 = vpop.permute.xlu1 %481  ;;  %v480_v0 = vpop.permute.xlu0 %479  ;;  %1159 = vmatmul.mubr.msk.f32.vlgmr.msra.gmra.mrb[0].mxu0 %vm220_vm10, %v1156_v62  ;;  %565 = vmatprep.mubr.f32.mxu1 %v1302_v3 }
  0xb2   : > { %v485_v1 = vsel %vm483_vm2, %v480_v0, %v482_v63  ;;  %1038 = vmatprep.mubr.f32.mxu0 %v1302_v3 }
  0xb3   : > { %v489_v2 = vsel %vm186_vm13, %v485_v1, 0.0 }
  0xb4   : > { %1141 = vmatprep.subr.msk.mxu1 %vm224_vm8, %v489_v2 }
  0xb5   : > { %v955_v4 = vpop.permute.xlu1 %954  ;;  %v953_v5 = vpop.permute.xlu0 %952 }
  0xb6   : > { %v958_v6 = vsel %vm956_vm3, %v953_v5, %v955_v4 }
  0xb7   : > { %v962_v7 = vsel %vm201_vm9, %v958_v6, 0.0 }
  0xb8   : > { %1161 = vmatprep.subr.msk.mxu0 %vm224_vm8, %v962_v7 }
  0xb9   : > { %v951_v8 = vpop.permute.xlu1 %950  ;;  %v478_v9 = vpop.permute.xlu0 %477 }
  0xba   : > { %v957_v10 = vsel %vm956_vm3, %v951_v8, %v953_v5  ;;  %v484_v3 = vsel %vm483_vm2, %v478_v9, %v480_v0 }
  0xbb   : > { %v961_v13 = vsel %vm200_vm12, %v957_v10, 0.0  ;;  %v488_v14 = vsel %vm185_vm14, %v484_v3, 0.0 }
  0xbc   : > { %1142 = vmatpush1.msk.msra.mxu1 %vm224_vm8, %v488_v14  ;;  %1162 = vmatpush1.msk.msra.mxu0 %vm224_vm8, %v961_v13 }
  0xbd   : > { %1143 = vmatmul.mubr.msk.f32.vlgmr.msra.gmra.mrb[0].mxu1 %vm220_vm10, %v1140_v11  ;;  %1163 = vmatmul.mubr.msk.f32.vlgmr.msra.gmra.mrb[0].mxu0 %vm220_vm10, %v1160_v12 }
 0x190   : > { %v567_v15 = vpop.f32.mrb[0].mxu1  ;;  %v1040_v16 = vpop.f32.mrb[0].mxu0 }
 0x191   : > { %v1170_v17 = vadd.f32 %v1040_v16, %v567_v15  ;;  %v569_v18 = vpop.f32.mrb[1].mxu1  ;;  %v1042_v19 = vpop.f32.mrb[1].mxu0 }
 0x192   : > { %v1171_v20 = vadd.f32 %v1042_v19, %v569_v18 }
 0x193   : > { %1047 = vst [vmem:[%s163_s24] sm:$0xff] %v1170_v17 }
 0x194   : > { %1048 = vst [vmem:[%s163_s24 + $0x8] sm:$0xff] %v1171_v20 }
 0x195   : > { %1250 = shalt.err (!%p1247_p3)
}
 0x196   : > { %s1251_s6 = scalar_lea.hbm %s1522_s28, 256  ;;  %s1255_s9 = scalar_lea.hbm %s1567_s3, 512 }
 0x197   : > { %p1252_p4 = scmp.ne.s32.totalorder %s1522_s28, %s1251_s6  ;;  %p1256_p9 = scmp.lt.u32.totalorder %s1522_s28, %s1567_s3 }
 0x198   : > { %p1257_p10 = scmp.lt.u32.totalorder %s1255_s9, %s1251_s6  ;;  %p1259_p12 = scmp.lt.u32.totalorder %s1251_s6, %s1522_s28 }
 0x199   : > { %p1253_p7 = pnand %p1252_p4, %p1370_p5 }
 0x19a   : > { %p1258_p11 = por %p1257_p10, %p1256_p9 }
 0x19b   : > { %p1254_p8 = pneg %p1253_p7 }
 0x19c   : > { %p1260_p13 = por %p1259_p12, %p1258_p11 }
 0x19e   : > { %p1261_p0 = pnand %p1260_p13, %p1254_p8 }
 0x1a0   : > { %1264 = shalt.err (!%p1261_p0)
}
 0x1a1   : > { %1187 = dma.vmem_to_hbm [thread:$0]  (%p1370_p5), %s1524_s25, 256, %s1522_s28, %s1050_s16  }
 0x1a2 PF: > { %p1193_p1 = scmp.ge.s32.totalorder %s1299_s15, 2  ;;  %s1076_s17 = sand.u32 1, %s1287_s12  }
 0x1a3   : > { %s1077_s19 = scalar_lea.sflag [#allocation3], %s1076_s17 }
 0x1a4   : > { %p1190_p2 = pnand %p1193_p1, %p1374_p6 }
 0x1a6   : > { %1282 = dma.done.wait (!%p1190_p2), %s1077_s19, 256  }
 0x1a7   : > { %1284 = vsyncadd (!%p1190_p2), %s1077_s19, 4294967040  ;;  %p13_p3 = scmp.ge.s32.totalorder %s1357_s18, 4   ;;  %s1570_s12 = smov %s1291_s13 }
 0x1a8   : > { %s1571_s13 = smov %s1295_s14  ;;  %s1572_s14 = smov %s1368_s21 }
 0x1a9   : > { %s1573_s15 = smov %s1357_s18  ;;  %15 = sbr.rel (!%p13_p3) target bundleno = 3 (0x3), region = 75 }
 0x1b0   :  { %1082 = vsyncpa [#allocation3], 1 }
 0x1b1   :  { %1084 = vsyncpa [#allocation3 + $0x1], 1 }

</bundles_post_ra>
